<compile_context>
chip_gen: v7x
topology: tpu7x:2x2x1
jax: 0.10.0
libtpu: 0.0.40
codegen_flags: <defaults>
</compile_context>

<pallas_src>
import functools

import jax
import jax.numpy as jnp
from jax.experimental import pallas as pl
from jax.experimental.pallas import tpu as pltpu

_LANES = 128
_SUBLANES = 8
_DEFAULT_TILE_ROWS = 2048   # 2048 x 128 f32 = 1 MiB per input block
_MIN_PALLAS_BATCH = 1024    # below this, plain XLA fusion wins


def _loss_block(dist_ref, target_ref, margin):
    """0.5 * where(target, dist, relu(margin - dist))**2 for one VMEM block."""
    d = dist_ref[...].astype(jnp.float32)
    t = target_ref[...].astype(jnp.float32)
    # target is a 0/1 label: a single select replaces the (1-t)*... + t*... blend.
    v = jnp.where(t > 0.5, d, jnp.maximum(margin - d, 0.0))
    return 0.5 * jnp.square(v)


def _reduce_kernel(dist_ref, target_ref, out_ref, *, margin, inv_n,
                   n_valid, needs_mask):
    """Accumulate per-tile partial sums into a resident (1,1) SMEM scalar."""
    step = pl.program_id(0)

    @pl.when(step == 0)
    def _init():
        out_ref[0, 0] = jnp.float32(0.0)

    loss = _loss_block(dist_ref, target_ref, margin)

    if needs_mask:
        # Mask out the padded lane tail and any garbage rows of a partial
        # last block via the global flattened element index.
        tile_rows, lanes = loss.shape
        row = jax.lax.broadcasted_iota(jnp.int32, loss.shape, 0) + step * tile_rows
        lane = jax.lax.broadcasted_iota(jnp.int32, loss.shape, 1)
        loss = jnp.where(row * lanes + lane < n_valid, loss, 0.0)

    out_ref[0, 0] += jnp.sum(loss)

    if inv_n is not None:  # 'mean': apply 1/N once, on the last grid step.
        @pl.when(step == pl.num_programs(0) - 1)
        def _finalize():
            out_ref[0, 0] = out_ref[0, 0] * jnp.float32(inv_n)


def _none_kernel(dist_ref, target_ref, out_ref, *, margin):
    out_ref[...] = _loss_block(dist_ref, target_ref, margin).astype(out_ref.dtype)


def _contrastive_loss_jnp(dist, target, margin, reduction):
    """Plain-XLA path for tiny batches (kernel launch overhead >> work)."""
    d = dist.astype(jnp.float32)
    t = target.astype(jnp.float32)
    loss = (1.0 - t) * (0.5 * jnp.square(jnp.maximum(margin - d, 0.0))) \
        + t * (0.5 * jnp.square(d))
    if reduction == "mean":
        return jnp.mean(loss)
    if reduction == "sum":
        return jnp.sum(loss)
    return loss.astype(dist.dtype)


def contrastive_loss(dist, target, *, margin, reduction="mean", eps=1e-8,
                     tile_rows=None, force_pallas=False):
    """Pallas implementation of ContrastiveLoss.forward.

    Args:
      dist:   (batch,) distances (any float dtype; passed through uncast).
      target: (batch,) 0/1 labels (bool / int / float; passed through uncast).
      margin: scalar margin (Python float).
      reduction: 'mean' | 'sum' | 'none'.
      eps: unused in the forward pass (API parity with the PyTorch module).
      tile_rows: rows per grid block (rounded down to a multiple of 8);
        None = auto (2048).
      force_pallas: run the Pallas path even for tiny batches.
    """
    del eps  # not used by the PyTorch forward either
    if reduction not in ("mean", "sum", "none"):
        raise ValueError(f"unknown reduction {reduction!r}")
    assert dist.ndim == 1 and target.shape == dist.shape
    b = dist.shape[0]

    if b < _MIN_PALLAS_BATCH and not force_pallas:
        return _contrastive_loss_jnp(dist, target, margin, reduction)

    # View as a lane-dense (rows, 128) slab.  Free reshape when b % 128 == 0;
    # otherwise zero-pad only the <128-element lane tail (masked in-kernel).
    rows = pl.cdiv(b, _LANES)
    pad = rows * _LANES - b
    if pad:
        dist2 = jnp.pad(dist, (0, pad)).reshape(rows, _LANES)
        target2 = jnp.pad(target, (0, pad)).reshape(rows, _LANES)
    else:
        dist2 = dist.reshape(rows, _LANES)
        target2 = target.reshape(rows, _LANES)

    # Pick the block row count.  A block equal to the full row extent is
    # always layout-legal; otherwise it must be a multiple of 8 sublanes.
    if tile_rows is None:
        tile_rows = _DEFAULT_TILE_ROWS
    tile_rows = int(tile_rows)
    if tile_rows >= rows:
        tile_rows = rows
    else:
        tile_rows = max(_SUBLANES, (tile_rows // _SUBLANES) * _SUBLANES)

    n_blocks = pl.cdiv(rows, tile_rows)
    grid = (n_blocks,)
    in_specs = [
        pl.BlockSpec((tile_rows, _LANES), lambda i: (i, 0)),
        pl.BlockSpec((tile_rows, _LANES), lambda i: (i, 0)),
    ]

    if reduction == "none":
        out = pl.pallas_call(
            functools.partial(_none_kernel, margin=float(margin)),
            out_shape=jax.ShapeDtypeStruct((rows, _LANES), dist.dtype),
            grid=grid,
            in_specs=in_specs,
            out_specs=pl.BlockSpec((tile_rows, _LANES), lambda i: (i, 0)),
            compiler_params=pltpu.CompilerParams(
                dimension_semantics=("parallel",)),
        )(dist2, target2)
        flat = out.reshape(rows * _LANES)
        return flat if pad == 0 else flat[:b]

    # 'mean' / 'sum': resident SMEM scalar accumulator, sequential grid.
    needs_mask = (n_blocks * tile_rows * _LANES) != b
    inv_n = (1.0 / b) if reduction == "mean" else None
    out = pl.pallas_call(
        functools.partial(_reduce_kernel, margin=float(margin), inv_n=inv_n,
                          n_valid=b, needs_mask=needs_mask),
        out_shape=jax.ShapeDtypeStruct((1, 1), jnp.float32),
        grid=grid,
        in_specs=in_specs,
        out_specs=pl.BlockSpec(memory_space=pltpu.SMEM),
        compiler_params=pltpu.CompilerParams(
            dimension_semantics=("arbitrary",)),
    )(dist2, target2)
    return out[0, 0]


def _reference(dist, target, margin, reduction):
    d = dist.astype(jnp.float32)
    t = target.astype(jnp.float32)
    repel = (1.0 - t) * (0.5 * jnp.square(jnp.maximum(margin - d, 0.0)))
    attract = t * 0.5 * jnp.square(d)
    loss = repel + attract
    if reduction == "mean":
        return jnp.mean(loss)
    if reduction == "sum":
        return jnp.sum(loss)
    return loss


if __name__ == "__main__":
    key = jax.random.PRNGKey(0)
    margin = 1.0
    ok = True

    # (batch, force_pallas, tile_rows, bool_target):
    #   - tiny batch via the plain-jnp fallback,
    #   - tiny batch forced through Pallas (single padded (1,128) block),
    #   - b % 128 == 0 with a partial last block (mask, no pad),
    #   - lane-tail pad + partial-block mask,
    #   - auto Pallas path, single full-extent block, bool targets,
    #   - multi-block default (2048x128) tiling with a lane tail.
    cases = [
        (8,         False, None, False),
        (8,         True,  None, False),
        (2560,      True,  8,    False),
        (3000,      True,  8,    False),
        (4096,      False, None, True),
        (1_000_000, False, None, False),
    ]

    for case_idx, (batch, force, trows, bool_t) in enumerate(cases):
        k1, k2 = jax.random.split(jax.random.fold_in(key, case_idx))
        dist = jax.random.uniform(k1, (batch,), dtype=jnp.float32,
                                  minval=0.0, maxval=2.0)
        target = jax.random.bernoulli(k2, 0.5, (batch,))
        if not bool_t:
            target = target.astype(jnp.float32)
        for reduction in ("mean", "sum", "none"):
            out = contrastive_loss(dist, target, margin=margin,
                                   reduction=reduction,
                                   tile_rows=trows, force_pallas=force)
            out = jax.block_until_ready(out)
            ref = _reference(dist, target, margin, reduction)
            if not jnp.allclose(out, ref, atol=1e-4, rtol=1e-4):
                ok = False
                print(f"MISMATCH batch={batch} force={force} "
                      f"reduction={reduction}")

    if ok:
        print("KERNEL_OK")
</pallas_src>

<mosaic_0001>
module attributes {stable_mosaic.version = 11 : i64} {
  func.func @_reduce_kernel(%arg0: i32, %arg1: memref<1x128xf32, #tpu.memory_space<vmem>>, %arg2: memref<1x128xf32, #tpu.memory_space<vmem>>, %arg3: memref<1x1xf32, #tpu.memory_space<smem>>) attributes {dimension_semantics = [#tpu.dimension_semantics<arbitrary>], iteration_bounds = array<i64: 1>, scalar_prefetch = 0 : i64, scratch_operands = 0 : i64, tpu.core_type = #tpu.core_type<tc>, window_params = [{transform_indices = @transform_0, window_bounds = array<i64: 1, 128>}, {transform_indices = @transform_1, window_bounds = array<i64: 1, 128>}, {transform_indices = @transform_2, window_bounds = array<i64: 1, 1>}]} {
    %c0_i32 = arith.constant 0 : i32
    %0 = arith.cmpi eq, %arg0, %c0_i32 : i32
    %1 = arith.extui %0 : i1 to i32
    %c0_i32_0 = arith.constant 0 : i32
    %2 = arith.cmpi ne, %1, %c0_i32_0 : i32
    scf.if %2 {
      %cst_15 = arith.constant 0.000000e+00 : f32
      %c0_16 = arith.constant 0 : index
      %c0_17 = arith.constant 0 : index
      %37 = memref.load %arg3[%c0_16, %c0_17] : memref<1x1xf32, #tpu.memory_space<smem>>
      memref.store %cst_15, %arg3[%c0_16, %c0_17] : memref<1x1xf32, #tpu.memory_space<smem>>
    } else {
    }
    %c0 = arith.constant 0 : index
    %c0_1 = arith.constant 0 : index
    %3 = vector.load %arg1[%c0, %c0_1] : memref<1x128xf32, #tpu.memory_space<vmem>>, vector<1x128xf32>
    %c0_2 = arith.constant 0 : index
    %c0_3 = arith.constant 0 : index
    %4 = vector.load %arg2[%c0_2, %c0_3] : memref<1x128xf32, #tpu.memory_space<vmem>>, vector<1x128xf32>
    %cst = arith.constant 5.000000e-01 : f32
    %5 = vector.broadcast %cst : f32 to vector<1x128xf32>
    %6 = arith.cmpf ogt, %4, %5 : vector<1x128xf32>
    %cst_4 = arith.constant 1.000000e+00 : f32
    %7 = vector.broadcast %cst_4 : f32 to vector<1x128xf32>
    %8 = arith.subf %7, %3 : vector<1x128xf32>
    %cst_5 = arith.constant 0.000000e+00 : f32
    %9 = vector.broadcast %cst_5 : f32 to vector<1x128xf32>
    %10 = arith.maximumf %8, %9 : vector<1x128xf32>
    %11 = arith.select %6, %3, %10 : vector<1x128xi1>, vector<1x128xf32>
    %12 = arith.mulf %11, %11 : vector<1x128xf32>
    %cst_6 = arith.constant 5.000000e-01 : f32
    %13 = vector.broadcast %cst_6 : f32 to vector<1x128xf32>
    %14 = arith.mulf %13, %12 : vector<1x128xf32>
    %15 = tpu.iota {dimensions = array<i32: 0>} : vector<1x128xi32>
    %c1_i32 = arith.constant 1 : i32
    %16 = arith.muli %arg0, %c1_i32 : i32
    %17 = vector.broadcast %16 : i32 to vector<1x128xi32>
    %18 = arith.addi %15, %17 : vector<1x128xi32>
    %19 = tpu.iota {dimensions = array<i32: 1>} : vector<1x128xi32>
    %c128_i32 = arith.constant 128 : i32
    %20 = vector.broadcast %c128_i32 : i32 to vector<1x128xi32>
    %21 = arith.muli %18, %20 : vector<1x128xi32>
    %22 = arith.addi %21, %19 : vector<1x128xi32>
    %c8_i32 = arith.constant 8 : i32
    %23 = vector.broadcast %c8_i32 : i32 to vector<1x128xi32>
    %24 = arith.cmpi slt, %22, %23 : vector<1x128xi32>
    %cst_7 = arith.constant 0.000000e+00 : f32
    %25 = vector.broadcast %cst_7 : f32 to vector<1x128xf32>
    %26 = arith.select %24, %14, %25 : vector<1x128xi1>, vector<1x128xf32>
    %c0_8 = arith.constant 0 : index
    %c0_9 = arith.constant 0 : index
    %27 = memref.load %arg3[%c0_8, %c0_9] : memref<1x1xf32, #tpu.memory_space<smem>>
    %28 = vector.shape_cast %26 : vector<1x128xf32> to vector<1x1x128xf32>
    %cst_10 = arith.constant dense<0.000000e+00> : vector<1xf32>
    %29 = vector.multi_reduction <add>, %28, %cst_10 [1, 2] : vector<1x1x128xf32> to vector<1xf32>
    %30 = vector.shape_cast %29 : vector<1xf32> to vector<1x1x1xf32>
    %31 = vector.extract %30[0, 0, 0] : f32 from vector<1x1x1xf32>
    %32 = arith.addf %27, %31 : f32
    %c0_11 = arith.constant 0 : index
    %c0_12 = arith.constant 0 : index
    %33 = memref.load %arg3[%c0_11, %c0_12] : memref<1x1xf32, #tpu.memory_space<smem>>
    memref.store %32, %arg3[%c0_11, %c0_12] : memref<1x1xf32, #tpu.memory_space<smem>>
    %c0_i32_13 = arith.constant 0 : i32
    %34 = arith.cmpi eq, %arg0, %c0_i32_13 : i32
    %35 = arith.extui %34 : i1 to i32
    %c0_i32_14 = arith.constant 0 : i32
    %36 = arith.cmpi ne, %35, %c0_i32_14 : i32
    scf.if %36 {
      %c0_15 = arith.constant 0 : index
      %c0_16 = arith.constant 0 : index
      %37 = memref.load %arg3[%c0_15, %c0_16] : memref<1x1xf32, #tpu.memory_space<smem>>
      %cst_17 = arith.constant 1.250000e-01 : f32
      %38 = arith.mulf %37, %cst_17 : f32
      %c0_18 = arith.constant 0 : index
      %c0_19 = arith.constant 0 : index
      %39 = memref.load %arg3[%c0_18, %c0_19] : memref<1x1xf32, #tpu.memory_space<smem>>
      memref.store %38, %arg3[%c0_18, %c0_19] : memref<1x1xf32, #tpu.memory_space<smem>>
    } else {
    }
    return
  }
  func.func @transform_0(%arg0: i32) -> (i32, i32) {
    %c0_i32 = arith.constant 0 : i32
    %c0_i32_0 = arith.constant 0 : i32
    return %arg0, %c0_i32 : i32, i32
  }
  func.func @transform_1(%arg0: i32) -> (i32, i32) {
    %c0_i32 = arith.constant 0 : i32
    %c0_i32_0 = arith.constant 0 : i32
    return %arg0, %c0_i32 : i32, i32
  }
  func.func @transform_2(%arg0: i32) -> (i32, i32) {
    %c0_i32 = arith.constant 0 : i32
    %c0_i32_0 = arith.constant 0 : i32
    %c0_i32_1 = arith.constant 0 : i32
    return %c0_i32, %c0_i32_0 : i32, i32
  }
}

</mosaic_0001>

<bundles_post_ra>
// kernel: tpu_custom_call.1
= control target key start
LH: loop header
LB: loop body
LE: loop exit
PB: predicated region body
PF: predicated region fallthrough
CT: control target
= control target key end

     0   :  { %7 = vsyncpa [#allocation3], 0  ;;  %s168_s0 = inlined_call_operand.hbm [shape: f32[1,128], index: 0, kind: input, shape index: {}]   ;;  %s169_s1 = inlined_call_operand.vmem [shape: f32[1,128], index: 1, kind: input, shape index: {}]   ;;  %s170_s2 = inlined_call_operand.hbm [shape: f32[1,1], index: 2, kind: output, shape index: {}]  }
   0x1   :  { %8 = vsyncpa [#allocation4], 0  ;;  %s124_s9 = smov [#allocation2]   ;;  %s88_s13 = scalar_lea.hbm %s168_s0, 16 }
   0x2   :  { %s15_s10 = sshll.u32 %s124_s9, 4  ;;  %p89_p0 = scmp.ne.s32.totalorder %s168_s0, %s88_s13  ;;  %s16_s10 = int_to_ptr.vmem [resolvable:$true] %s15_s10 }
   0x3   :  { %p92_p1 = scmp.lt.u32.totalorder %s88_s13, %s168_s0 }
   0x5   :  { %p94_p2 = pnand %p92_p1, %p89_p0 }
   0x7   :  { %97 = shalt.err (!%p94_p2)
}
   0x8   :  { %s98_s18 = scalar_lea.vmem %s16_s10, 16  ;;  %s102_s19 = scalar_lea.vmem %s16_s10, 32 }
   0x9   :  { %p99_p3 = scmp.ne.s32.totalorder %s16_s10, %s98_s18  ;;  %p103_p4 = scmp.lt.s32.totalorder %s16_s10, %s16_s10 }
   0xa   :  { %p104_p5 = scmp.lt.s32.totalorder %s102_s19, %s98_s18 }
   0xc   :  { %p105_p6 = por %p104_p5, %p103_p4 }
   0xe   :  { %p106_p7 = pnand %p105_p6, %p99_p3 }
  0x10   :  { %109 = shalt.err (!%p106_p7)
}
  0x11   :  { %18 = dma.hbm_to_vmem [thread:$0]  %s168_s0, 16, %s16_s10, [#allocation3]  }
  0x12   :  { %120 = dma.done.wait [#allocation3], 16  }
  0x13   :  { %121 = vsyncadd [#allocation3], 4294967280  ;;  %v38_v0 = vlaneseq  ;;  %v30_v4 = vld [vmem:[#allocation2] sm:$0x1]  ;;  %vm49_vm2 = vcmask 1040384   ;;  %s110_s26 = scalar_lea.hbm %s170_s2, 16 }
  0x14   :  { %v31_v5 = vld [vmem:[%s169_s1] sm:$0x1]  ;;  %v33_v6 = vsub.f32 1.0, %v30_v4  ;;  %p111_p8 = scmp.ne.s32.totalorder %s170_s2, %s110_s26  ;;  %p114_p9 = scmp.lt.u32.totalorder %s110_s26, %s170_s2 }
  0x15   :  { %v39_v1 = vshrl.u32 %v38_v0, 7  ;;  %v43_v2 = vand.u32 127, %v38_v0  ;;  %vm32_vm0 = vcmp.gt.f32.partialorder %v31_v5, 0.5 }
  0x16   :  { %v34_v7 = vmax.f32 %v33_v6, 0.0  ;;  %p116_p10 = pnand %p114_p9, %p111_p8 }
  0x17   :  { %v44_v3 = vmul.u32 128, %v39_v1 }
  0x18   :  { %v35_v9 = vsel %vm32_vm0, %v30_v4, %v34_v7 }
  0x19   :  { %v45_v8 = vadd.s32 %v44_v3, %v43_v2  ;;  %v36_v10 = vmul.f32 %v35_v9, %v35_v9 }
  0x1b   :  { %vm46_vm1 = vcmp.lt.s32.totalorder %v45_v8, 8  ;;  %v37_v11 = vmul.f32 0.5, %v36_v10 }
  0x1d   :  { %v47_v12 = vsel %vm46_vm1, %v37_v11, 0.0 }
  0x1e   :  { %v50_v13 = vsel %vm49_vm2, %v47_v12, 0.0 }
  0x1f   :  { %51 = vadd.xlane.f32.xlu0 %v50_v13 }
  0xac   :  { %v52_v14 = vpop.xlane.xlu0 %51 }
  0xad   :  { %v53_v15 = vrot.slane %v52_v14, 4 }
  0xaf   :  { %v54_v16 = vadd.f32 %v53_v15, %v52_v14 }
  0xb1   :  { %v55_v17 = vrot.slane %v54_v16, 2 }
  0xb3   :  { %v56_v18 = vadd.f32 %v55_v17, %v54_v16 }
  0xb5   :  { %v57_v19 = vrot.slane %v56_v18, 1 }
  0xb7   :  { %v58_v20 = vadd.f32 %v57_v19, %v56_v18 }
  0xb9   :  { %83 = vpush %v58_v20 }
  0xea   :  { %s84_s0 = spop %83 }
  0xeb   :  { %s67_s1 = smul.f32 0.125, %s84_s0 }
  0xed   :  { %68 = sst [smem:[#allocation5]] %s67_s1 }
  0xee   :  { %119 = shalt.err (!%p116_p10)
}
  0xef   :  { %s125_s3 = smov [#allocation5]  }
  0xf0   :  { %76 = dma.smem_to_hbm %s125_s3, 16, %s170_s2, [#allocation4]  }
  0xf1   :  { %122 = dma.done.wait [#allocation4], 16  }
  0xf2   :  { %123 = vsyncadd [#allocation4], 4294967280 }
  0xf3   :  { %80 = sfence }
  0xf4   :  { %81 = vsyncpa [#allocation3], 1 }
  0xf5   :  { %82 = vsyncpa [#allocation4], 1 }

</bundles_post_ra>
